<compile_context>
chip_gen: v7x
topology: tpu7x:2x2x1
jax: 0.10.0
libtpu: 0.0.40
codegen_flags: <defaults>
</compile_context>

<pallas_src>
import functools

import jax
import jax.numpy as jnp
from jax.experimental import pallas as pl
from jax.experimental.pallas import tpu as pltpu

LANES = 128      # lane width (last dim)
SUBLANES = 8     # sublane width (second-to-last dim)

# ----------------------------------------------------------------------------
# Module configuration (mirrors modules_config in the PyTorch __init__).
# Dims are chosen so the chain is consistent (no runtime "adjust_layer").
# ----------------------------------------------------------------------------
MODULES_CONFIG = [
    dict(input_source="initial_input", input_dim=4, widths=[32, 32],
         output_dim=16, activation_fn_name="relu", use_batchnorm=False,
         module_type="arithmetic"),
    dict(input_source="module_0", input_dim=16, widths=[32],
         output_dim=8, activation_fn_name="relu", use_batchnorm=False,
         module_type="algebraic"),
]


def _round_up(x, m):
    return (x + m - 1) // m * m


def build_layer_plan(modules_config):
    """Flatten the chain of SubNetModules into a list of (in, out, act) layers."""
    plan = []
    for cfg in modules_config:
        dims = [cfg["input_dim"]] + list(cfg["widths"]) + [cfg["output_dim"]]
        n_layers = len(dims) - 1
        for li in range(n_layers):
            apply_act = li < n_layers - 1  # activation on hidden layers only
            plan.append((dims[li], dims[li + 1], apply_act))
    return plan


def group_width(layer_plan):
    """Smallest power-of-two lane-group width that holds every layer dim."""
    max_w = max(max(din, dout) for (din, dout, _a) in layer_plan)
    assert max_w <= LANES, "layer width exceeds one vreg lane row"
    for cand in (8, 16, 32, 64, 128):
        if max_w <= cand:
            return cand
    return LANES


def init_params(key, layer_plan):
    """Deterministic parameter init (Xavier-uniform weights, zero biases)."""
    params = []
    for (din, dout, _act) in layer_plan:
        key, wk = jax.random.split(key)
        limit = jnp.sqrt(6.0 / (din + dout)).astype(jnp.float32)
        w = jax.random.uniform(wk, (din, dout), jnp.float32, -limit, limit)
        b = jnp.zeros((dout,), jnp.float32)
        params.append((w, b))
    return params


def pack_params(params, layer_plan):
    """Pack per-layer params into two resident slabs with block-diagonal
    lane-group replication (one weight DMA + one bias DMA total).

    w_slab: [n_layers, 128, 128] bf16; layer li's (din,dout) block replicated
            on the diagonal once per lane group, zeros elsewhere.
    b_slab: [round_up(n_layers, 8), 128] f32; bias replicated per lane group.

    Invariant: padded weight ROWS are zero, so any garbage in padded
    activation lanes is annihilated by the next matmul.
    """
    nl = len(layer_plan)
    gw = group_width(layer_plan)
    groups = LANES // gw
    w_slab = jnp.zeros((nl, LANES, LANES), jnp.bfloat16)
    b_slab = jnp.zeros((_round_up(nl, SUBLANES), LANES), jnp.float32)
    for li, ((din, dout, _a), (w, b)) in enumerate(zip(layer_plan, params)):
        assert din <= gw and dout <= gw
        wb = w.astype(jnp.bfloat16)
        for g in range(groups):
            lo = g * gw
            w_slab = w_slab.at[li, lo:lo + din, lo:lo + dout].set(wb)
            b_slab = b_slab.at[li, lo:lo + dout].set(b)
    return w_slab, b_slab


# ----------------------------------------------------------------------------
# Pallas kernel: whole chained-MLP hot path (matmuls + bias + ReLU), one tile
# of the (lane-packed) batch per grid step. Weight tiles are block-diagonal,
# so the 4 lane groups compute 4 independent logical batch rows per vreg row.
# ----------------------------------------------------------------------------
def _mlp_chain_kernel(act_flags, x_ref, w_ref, b_ref, out_ref):
    # x_ref:   [tile, 128]          bf16  lane-packed activations (4 rows/row)
    # w_ref:   [n_layers, 128, 128] bf16  block-diagonal weight slab (resident)
    # b_ref:   [n_layers_pad, 128]  f32   lane-replicated bias slab (resident)
    # out_ref: [tile, 128]          f32   lane-dense store; wrapper unpacks
    n_layers = len(act_flags)
    h = x_ref[...]                                      # bf16
    for li, apply_act in enumerate(act_flags):
        # bf16 operands -> MXU native; accumulate in f32.
        acc = jnp.dot(h, w_ref[li], preferred_element_type=jnp.float32)
        acc = acc + b_ref[pl.ds(li, 1), :]              # (1,128) f32 bias row
        if apply_act:
            acc = jnp.maximum(acc, 0.0)                 # relu (f32, v5e-safe)
        if li < n_layers - 1:
            h = acc.astype(jnp.bfloat16)                # next dot's LHS
        else:
            out_ref[...] = acc                          # lane-dense f32 store


def modular_math_reasoning_forward(x, w_slab, b_slab, layer_plan,
                                   *, batch_tile=None):
    batch, in_dim = x.shape
    nl = len(layer_plan)
    out_dim = layer_plan[-1][1]
    act_flags = tuple(a for (_i, _o, a) in layer_plan)
    gw = group_width(layer_plan)
    groups = LANES // gw

    # --- packed-batch geometry -------------------------------------------
    bp = -(-batch // groups)                 # packed rows (4 logical rows each)
    bp_r = _round_up(max(bp, 1), SUBLANES)
    if batch_tile is None:
        batch_tile = min(512, bp_r)          # big tiles: ~85% of HBM roofline
        if batch_tile == bp_r and bp_r >= 2 * SUBLANES:
            # >=2 grid steps so v7x can shard the batch across both TCs
            batch_tile = _round_up(bp_r // 2, SUBLANES)
    batch_tile = max(SUBLANES, _round_up(batch_tile, SUBLANES))
    bp_pad = _round_up(bp_r, batch_tile)

    # --- lane-pack the input (bf16, 4 logical rows per 128-lane row) -------
    # row r = p*groups + g lives in lanes [g*gw, g*gw + in_dim) of packed row p.
    x_rows = jnp.zeros((bp_pad * groups, gw), jnp.bfloat16)
    x_rows = x_rows.at[:batch, :in_dim].set(x.astype(jnp.bfloat16))
    x_packed = x_rows.reshape(bp_pad, LANES)

    kernel = functools.partial(_mlp_chain_kernel, act_flags)

    out_packed = pl.pallas_call(
        kernel,
        out_shape=jax.ShapeDtypeStruct((bp_pad, LANES), jnp.float32),
        grid_spec=pltpu.PrefetchScalarGridSpec(
            num_scalar_prefetch=0,
            grid=(bp_pad // batch_tile,),
            in_specs=[
                # lane-packed batch tile, pipelined along the grid
                pl.BlockSpec((batch_tile, LANES), lambda i: (i, 0)),
                # packed weight slab: same block every step -> stays resident
                pl.BlockSpec((nl, LANES, LANES), lambda i: (0, 0, 0)),
                # packed bias slab: same block every step -> stays resident
                pl.BlockSpec((b_slab.shape[0], LANES), lambda i: (0, 0)),
            ],
            out_specs=pl.BlockSpec((batch_tile, LANES), lambda i: (i, 0)),
        ),
        compiler_params=pltpu.CompilerParams(
            dimension_semantics=("parallel",)),   # shard batch across TCs (v7x)
    )(x_packed, w_slab, b_slab)

    # --- unpack lanes back to logical rows ---------------------------------
    out_rows = out_packed.reshape(bp_pad * groups, gw)
    return out_rows[:batch, :out_dim]


# ----------------------------------------------------------------------------
# Plain-JAX reference (mirrors the kernel's bf16-weight / f32-accumulate math).
# ----------------------------------------------------------------------------
def reference_forward(x, params, layer_plan):
    h = x.astype(jnp.bfloat16)
    out = None
    n = len(layer_plan)
    for li, ((_din, _dout, apply_act), (w, b)) in enumerate(zip(layer_plan, params)):
        acc = jnp.dot(h, w.astype(jnp.bfloat16),
                      preferred_element_type=jnp.float32)
        acc = acc + b[None, :]
        if apply_act:
            acc = jnp.maximum(acc, 0.0)
        if li < n - 1:
            h = acc.astype(jnp.bfloat16)
        else:
            out = acc
    return out


if __name__ == "__main__":
    key = jax.random.PRNGKey(0)
    key, xk = jax.random.split(key)

    batch = 8
    x = jax.random.normal(xk, (batch, 4), jnp.float32)

    layer_plan = build_layer_plan(MODULES_CONFIG)
    params = init_params(key, layer_plan)
    w_slab, b_slab = pack_params(params, layer_plan)

    out = modular_math_reasoning_forward(x, w_slab, b_slab, layer_plan)
    out = jax.block_until_ready(out)

    ref = reference_forward(x, params, layer_plan)
    assert out.shape == (batch, MODULES_CONFIG[-1]["output_dim"])
    assert jnp.allclose(out, ref, atol=1e-4, rtol=1e-4)

    print("KERNEL_OK")
</pallas_src>

<mosaic_0001>
module attributes {stable_mosaic.version = 11 : i64} {
  func.func @_mlp_chain_kernel(%arg0: i32, %arg1: memref<8x128xbf16, #tpu.memory_space<vmem>>, %arg2: memref<5x128x128xbf16, #tpu.memory_space<vmem>>, %arg3: memref<8x128xf32, #tpu.memory_space<vmem>>, %arg4: memref<8x128xf32, #tpu.memory_space<vmem>>) attributes {dimension_semantics = [#tpu.dimension_semantics<parallel>], iteration_bounds = array<i64: 1>, scalar_prefetch = 0 : i64, scratch_operands = 0 : i64, tpu.core_type = #tpu.core_type<tc>, window_params = [{transform_indices = @transform_0, window_bounds = array<i64: 8, 128>}, {pipeline_mode = #tpu.pipeline_mode<synchronous>, transform_indices = @transform_1, window_bounds = array<i64: 5, 128, 128>}, {pipeline_mode = #tpu.pipeline_mode<synchronous>, transform_indices = @transform_2, window_bounds = array<i64: 8, 128>}, {transform_indices = @transform_3, window_bounds = array<i64: 8, 128>}]} {
    %c0 = arith.constant 0 : index
    %c0_0 = arith.constant 0 : index
    %0 = vector.load %arg1[%c0, %c0_0] : memref<8x128xbf16, #tpu.memory_space<vmem>>, vector<8x128xbf16>
    %c0_1 = arith.constant 0 : index
    %c0_2 = arith.constant 0 : index
    %c0_3 = arith.constant 0 : index
    %1 = vector.load %arg2[%c0_1, %c0_2, %c0_3] : memref<5x128x128xbf16, #tpu.memory_space<vmem>>, vector<1x128x128xbf16>
    %2 = vector.shape_cast %1 : vector<1x128x128xbf16> to vector<128x128xbf16>
    %cst = arith.constant dense<0.000000e+00> : vector<8x128xf32>
    %3 = tpu.matmul %0, %2, %cst {dimension_numbers = #tpu.dot_dimension_numbers<[1], [0], [0], [1], [0, 0, 1, 1], [], []>} : vector<8x128xbf16>, vector<128x128xbf16>, vector<8x128xf32> -> vector<8x128xf32>
    %c0_4 = arith.constant 0 : index
    %c0_5 = arith.constant 0 : index
    %4 = vector.load %arg3[%c0_4, %c0_5] : memref<8x128xf32, #tpu.memory_space<vmem>>, vector<1x128xf32>
    %5 = vector.broadcast %4 : vector<1x128xf32> to vector<8x128xf32>
    %6 = arith.addf %3, %5 : vector<8x128xf32>
    %cst_6 = arith.constant 0.000000e+00 : f32
    %7 = vector.broadcast %cst_6 : f32 to vector<8x128xf32>
    %8 = arith.maximumf %6, %7 : vector<8x128xf32>
    %9 = arith.truncf %8 : vector<8x128xf32> to vector<8x128xbf16>
    %c1 = arith.constant 1 : index
    %c0_7 = arith.constant 0 : index
    %c0_8 = arith.constant 0 : index
    %10 = vector.load %arg2[%c1, %c0_7, %c0_8] : memref<5x128x128xbf16, #tpu.memory_space<vmem>>, vector<1x128x128xbf16>
    %11 = vector.shape_cast %10 : vector<1x128x128xbf16> to vector<128x128xbf16>
    %cst_9 = arith.constant dense<0.000000e+00> : vector<8x128xf32>
    %12 = tpu.matmul %9, %11, %cst_9 {dimension_numbers = #tpu.dot_dimension_numbers<[1], [0], [0], [1], [0, 0, 1, 1], [], []>} : vector<8x128xbf16>, vector<128x128xbf16>, vector<8x128xf32> -> vector<8x128xf32>
    %c1_10 = arith.constant 1 : index
    %c0_11 = arith.constant 0 : index
    %13 = vector.load %arg3[%c1_10, %c0_11] : memref<8x128xf32, #tpu.memory_space<vmem>>, vector<1x128xf32>
    %14 = vector.broadcast %13 : vector<1x128xf32> to vector<8x128xf32>
    %15 = arith.addf %12, %14 : vector<8x128xf32>
    %cst_12 = arith.constant 0.000000e+00 : f32
    %16 = vector.broadcast %cst_12 : f32 to vector<8x128xf32>
    %17 = arith.maximumf %15, %16 : vector<8x128xf32>
    %18 = arith.truncf %17 : vector<8x128xf32> to vector<8x128xbf16>
    %c2 = arith.constant 2 : index
    %c0_13 = arith.constant 0 : index
    %c0_14 = arith.constant 0 : index
    %19 = vector.load %arg2[%c2, %c0_13, %c0_14] : memref<5x128x128xbf16, #tpu.memory_space<vmem>>, vector<1x128x128xbf16>
    %20 = vector.shape_cast %19 : vector<1x128x128xbf16> to vector<128x128xbf16>
    %cst_15 = arith.constant dense<0.000000e+00> : vector<8x128xf32>
    %21 = tpu.matmul %18, %20, %cst_15 {dimension_numbers = #tpu.dot_dimension_numbers<[1], [0], [0], [1], [0, 0, 1, 1], [], []>} : vector<8x128xbf16>, vector<128x128xbf16>, vector<8x128xf32> -> vector<8x128xf32>
    %c2_16 = arith.constant 2 : index
    %c0_17 = arith.constant 0 : index
    %22 = vector.load %arg3[%c2_16, %c0_17] : memref<8x128xf32, #tpu.memory_space<vmem>>, vector<1x128xf32>
    %23 = vector.broadcast %22 : vector<1x128xf32> to vector<8x128xf32>
    %24 = arith.addf %21, %23 : vector<8x128xf32>
    %25 = arith.truncf %24 : vector<8x128xf32> to vector<8x128xbf16>
    %c3 = arith.constant 3 : index
    %c0_18 = arith.constant 0 : index
    %c0_19 = arith.constant 0 : index
    %26 = vector.load %arg2[%c3, %c0_18, %c0_19] : memref<5x128x128xbf16, #tpu.memory_space<vmem>>, vector<1x128x128xbf16>
    %27 = vector.shape_cast %26 : vector<1x128x128xbf16> to vector<128x128xbf16>
    %cst_20 = arith.constant dense<0.000000e+00> : vector<8x128xf32>
    %28 = tpu.matmul %25, %27, %cst_20 {dimension_numbers = #tpu.dot_dimension_numbers<[1], [0], [0], [1], [0, 0, 1, 1], [], []>} : vector<8x128xbf16>, vector<128x128xbf16>, vector<8x128xf32> -> vector<8x128xf32>
    %c3_21 = arith.constant 3 : index
    %c0_22 = arith.constant 0 : index
    %29 = vector.load %arg3[%c3_21, %c0_22] : memref<8x128xf32, #tpu.memory_space<vmem>>, vector<1x128xf32>
    %30 = vector.broadcast %29 : vector<1x128xf32> to vector<8x128xf32>
    %31 = arith.addf %28, %30 : vector<8x128xf32>
    %cst_23 = arith.constant 0.000000e+00 : f32
    %32 = vector.broadcast %cst_23 : f32 to vector<8x128xf32>
    %33 = arith.maximumf %31, %32 : vector<8x128xf32>
    %34 = arith.truncf %33 : vector<8x128xf32> to vector<8x128xbf16>
    %c4 = arith.constant 4 : index
    %c0_24 = arith.constant 0 : index
    %c0_25 = arith.constant 0 : index
    %35 = vector.load %arg2[%c4, %c0_24, %c0_25] : memref<5x128x128xbf16, #tpu.memory_space<vmem>>, vector<1x128x128xbf16>
    %36 = vector.shape_cast %35 : vector<1x128x128xbf16> to vector<128x128xbf16>
    %cst_26 = arith.constant dense<0.000000e+00> : vector<8x128xf32>
    %37 = tpu.matmul %34, %36, %cst_26 {dimension_numbers = #tpu.dot_dimension_numbers<[1], [0], [0], [1], [0, 0, 1, 1], [], []>} : vector<8x128xbf16>, vector<128x128xbf16>, vector<8x128xf32> -> vector<8x128xf32>
    %c4_27 = arith.constant 4 : index
    %c0_28 = arith.constant 0 : index
    %38 = vector.load %arg3[%c4_27, %c0_28] : memref<8x128xf32, #tpu.memory_space<vmem>>, vector<1x128xf32>
    %39 = vector.broadcast %38 : vector<1x128xf32> to vector<8x128xf32>
    %40 = arith.addf %37, %39 : vector<8x128xf32>
    %c0_29 = arith.constant 0 : index
    %c0_30 = arith.constant 0 : index
    %41 = vector.load %arg4[%c0_29, %c0_30] : memref<8x128xf32, #tpu.memory_space<vmem>>, vector<8x128xf32>
    tpu.vector_store %arg4[%c0_29, %c0_30], %40 {strides = array<i32>} : memref<8x128xf32, #tpu.memory_space<vmem>>, vector<8x128xf32>,
    return
  }
  func.func @transform_0(%arg0: i32) -> (i32, i32) {
    %c0_i32 = arith.constant 0 : i32
    %c0_i32_0 = arith.constant 0 : i32
    return %arg0, %c0_i32 : i32, i32
  }
  func.func @transform_1(%arg0: i32) -> (i32, i32, i32) {
    %c0_i32 = arith.constant 0 : i32
    %c0_i32_0 = arith.constant 0 : i32
    %c0_i32_1 = arith.constant 0 : i32
    %c0_i32_2 = arith.constant 0 : i32
    return %c0_i32, %c0_i32_0, %c0_i32_1 : i32, i32, i32
  }
  func.func @transform_2(%arg0: i32) -> (i32, i32) {
    %c0_i32 = arith.constant 0 : i32
    %c0_i32_0 = arith.constant 0 : i32
    %c0_i32_1 = arith.constant 0 : i32
    return %c0_i32, %c0_i32_0 : i32, i32
  }
  func.func @transform_3(%arg0: i32) -> (i32, i32) {
    %c0_i32 = arith.constant 0 : i32
    %c0_i32_0 = arith.constant 0 : i32
    return %arg0, %c0_i32 : i32, i32
  }
}

</mosaic_0001>

<bundles_post_ra>
// kernel: tpu_custom_call.1
= control target key start
LH: loop header
LB: loop body
LE: loop exit
PB: predicated region body
PF: predicated region fallthrough
CT: control target
= control target key end

     0   :  { %8 = vsyncpa [#allocation3], 0  ;;  %s1085_s0 = inlined_call_operand.hbm [shape: bf16[8,128], index: 0, kind: input, shape index: {}]   ;;  %s1086_s1 = inlined_call_operand.hbm [shape: bf16[5,128,128], index: 1, kind: input, shape index: {}]   ;;  %s1087_s2 = inlined_call_operand.hbm [shape: f32[8,128], index: 2, kind: input, shape index: {}]   ;;  %s1088_s3 = inlined_call_operand.hbm [shape: f32[8,128], index: 3, kind: output, shape index: {}]  }
   0x1   :  { %9 = vsyncpa [#allocation6], 0 }
   0x2   :  { %10 = vsyncpa [#allocation4], 0  ;;  %s959_s12 = smov [#allocation5]   ;;  %s865_s16 = scalar_lea.hbm %s1086_s1, 5120 }
   0x3   :  { %s26_s13 = sshll.u32 %s959_s12, 4  ;;  %p866_p0 = scmp.ne.s32.totalorder %s1086_s1, %s865_s16  ;;  %s27_s13 = int_to_ptr.vmem [resolvable:$true] %s26_s13 }
   0x4   :  { %p869_p1 = scmp.lt.u32.totalorder %s865_s16, %s1086_s1 }
   0x6   :  { %p871_p2 = pnand %p869_p1, %p866_p0 }
   0x8   :  { %874 = shalt.err (!%p871_p2)
}
   0x9   :  { %s875_s21 = scalar_lea.vmem %s27_s13, 5120  ;;  %p880_p4 = scmp.lt.s32.totalorder %s27_s13, %s27_s13 }
   0xa   :  { %p876_p3 = scmp.ne.s32.totalorder %s27_s13, %s875_s21  ;;  %p881_p5 = scmp.lt.s32.totalorder %s875_s21, %s875_s21 }
   0xc   :  { %p882_p6 = por %p881_p5, %p880_p4 }
   0xe   :  { %p883_p7 = pnand %p882_p6, %p876_p3 }
  0x10   :  { %886 = shalt.err (!%p883_p7)
}
  0x11   :  { %s960_s22 = smov 64   ;;  %s961_s23 = smov 4  }
  0x12   :  { %32 = dma.hbm_to_vmem [thread:$0]  %s1086_s1, 5120, %s27_s13, [#allocation6], %s960_s22, %s960_s22, %s961_s23  }
  0x13   :  { %s962_s26 = smov [#allocation2]   ;;  %s963_s28 = smov [#allocation7]  }
  0x14   :  { %s17_s27 = sshll.u32 %s962_s26, 4  ;;  %s39_s29 = sshll.u32 %s963_s28, 4  ;;  %s18_s27 = int_to_ptr.vmem [resolvable:$true] %s17_s27  ;;  %s40_s29 = int_to_ptr.vmem [resolvable:$true] %s39_s29 }
  0x15   :  { %s887_s5 = scalar_lea.hbm %s1085_s0, 64 }
  0x16   :  { %p888_p8 = scmp.ne.s32.totalorder %s1085_s0, %s887_s5  ;;  %p891_p9 = scmp.lt.u32.totalorder %s887_s5, %s1085_s0 }
  0x18   :  { %p893_p10 = pnand %p891_p9, %p888_p8 }
  0x1a   :  { %896 = shalt.err (!%p893_p10)
}
  0x1b   :  { %s897_s1 = scalar_lea.vmem %s18_s27, 64  ;;  %p902_p12 = scmp.lt.s32.totalorder %s18_s27, %s18_s27 }
  0x1c   :  { %p898_p11 = scmp.ne.s32.totalorder %s18_s27, %s897_s1  ;;  %p903_p13 = scmp.lt.s32.totalorder %s897_s1, %s897_s1 }
  0x1e   :  { %p904_p0 = por %p903_p13, %p902_p12 }
  0x20   :  { %p905_p1 = pnand %p904_p0, %p898_p11 }
  0x22   :  { %908 = shalt.err (!%p905_p1)
}
  0x23   :  { %20 = dma.hbm_to_vmem [thread:$0]  %s1085_s0, 64, %s18_s27, [#allocation3]  }
  0x24   :  { %s909_s14 = scalar_lea.hbm %s1087_s2, 128 }
  0x25   :  { %p910_p2 = scmp.ne.s32.totalorder %s1087_s2, %s909_s14  ;;  %p913_p3 = scmp.lt.u32.totalorder %s909_s14, %s1087_s2 }
  0x27   :  { %p915_p4 = pnand %p913_p3, %p910_p2 }
  0x29   :  { %918 = shalt.err (!%p915_p4)
}
  0x2a   :  { %s919_s19 = scalar_lea.vmem %s40_s29, 128  ;;  %p924_p6 = scmp.lt.s32.totalorder %s40_s29, %s40_s29 }
  0x2b   :  { %p920_p5 = scmp.ne.s32.totalorder %s40_s29, %s919_s19  ;;  %p925_p7 = scmp.lt.s32.totalorder %s919_s19, %s919_s19 }
  0x2d   :  { %p926_p8 = por %p925_p7, %p924_p6 }
  0x2f   :  { %p927_p9 = pnand %p926_p8, %p920_p5 }
  0x31   :  { %930 = shalt.err (!%p927_p9)
}
  0x32   :  { %42 = dma.hbm_to_vmem [thread:$0]  %s1087_s2, 128, %s40_s29, [#allocation6]  }
  0x33   :  { %953 = dma.done.wait [#allocation3], 64  }
  0x34   :  { %954 = vsyncadd [#allocation3], 4294967232 }
  0x35   :  { %955 = dma.done.wait [#allocation6], 5248  }
  0x36   :  { %956 = vsyncadd [#allocation6], 4294962048  ;;  %v964_v0 = vmov 0.0   ;;  %vm965_vm0 = vmmov 0   ;;  %v825_v1 = vld [vmem:[#allocation5] sm:$0xff]   ;;  %v826_v2 = vld [vmem:[#allocation5 + $0x8] sm:$0xff]  }
  0x37   :  { %717 = vmatprep.subr.bf16.mxu0 %v964_v0  ;;  %733 = vmatprep.mubr.msk.bf16.mxu0 %vm965_vm0, %v964_v0  ;;  %v827_v3 = vld [vmem:[#allocation5 + $0x10] sm:$0xff]   ;;  %v833_v4 = vld [vmem:[#allocation5 + $0x40] sm:$0xff]   ;;  %v828_v5 = vld [vmem:[#allocation5 + $0x18] sm:$0xff]   ;;  %s966_s2 = smov [#allocation8]  }
  0x38   :  { %737 = vmatprep.subr.bf16.mxu1 %v964_v0  ;;  %753 = vmatprep.mubr.msk.bf16.mxu1 %vm965_vm0, %v964_v0  ;;  %v834_v6 = vld [vmem:[#allocation5 + $0x48] sm:$0xff]   ;;  %v829_v7 = vld [vmem:[#allocation5 + $0x20] sm:$0xff]   ;;  %v835_v8 = vld [vmem:[#allocation5 + $0x50] sm:$0xff]   ;;  %s617_s21 = sshll.u32 %s966_s2, 4  ;;  %s618_s21 = int_to_ptr.vmem [resolvable:$true] %s617_s21 }
  0x39   :  { %718 = vmatpush3.bf16.msra.mxu0 %v825_v1  ;;  %738 = vmatpush3.bf16.msra.mxu1 %v833_v4  ;;  %v830_v9 = vld [vmem:[#allocation5 + $0x28] sm:$0xff]   ;;  %v836_v10 = vld [vmem:[#allocation5 + $0x58] sm:$0xff]   ;;  %v831_v11 = vld [vmem:[#allocation5 + $0x30] sm:$0xff]   ;;  %s931_s22 = scalar_lea.vmem %s618_s21, 128  ;;  %p936_p11 = scmp.lt.s32.totalorder %s618_s21, %s618_s21 }
  0x3a   :  { %719 = vmatprep.subr.bf16.mxu0 %v964_v0  ;;  %739 = vmatprep.subr.bf16.mxu1 %v964_v0  ;;  %v837_v12 = vld [vmem:[#allocation5 + $0x60] sm:$0xff]   ;;  %v832_v13 = vld [vmem:[#allocation5 + $0x38] sm:$0xff]   ;;  %v838_v14 = vld [vmem:[#allocation5 + $0x68] sm:$0xff]   ;;  %p932_p10 = scmp.ne.s32.totalorder %s618_s21, %s931_s22  ;;  %p937_p12 = scmp.lt.s32.totalorder %s931_s22, %s931_s22 }
  0x3b   :  { %v53_v15 = vld [vmem:[#allocation2] sm:$0xf]  ;;  %v839_v16 = vld [vmem:[#allocation5 + $0x70] sm:$0xff]   ;;  %v841_v18 = vld [vmem:[#allocation5 + $0x80] sm:$0xff]  }
  0x3c   :  { %v840_v17 = vld [vmem:[#allocation5 + $0x78] sm:$0xff]   ;;  %v842_v19 = vld [vmem:[#allocation5 + $0x88] sm:$0xff]   ;;  %v843_v20 = vld [vmem:[#allocation5 + $0x90] sm:$0xff]   ;;  %p938_p13 = por %p937_p12, %p936_p11 }
  0x3d   :  { %720 = vmatpush3.bf16.msra.mxu0 %v826_v2  ;;  %740 = vmatpush3.bf16.msra.mxu1 %v834_v6  ;;  %v844_v21 = vld [vmem:[#allocation5 + $0x98] sm:$0xff]   ;;  %v845_v22 = vld [vmem:[#allocation5 + $0xa0] sm:$0xff]   ;;  %v846_v23 = vld [vmem:[#allocation5 + $0xa8] sm:$0xff]  }
  0x3e   :  { %721 = vmatprep.subr.bf16.mxu0 %v964_v0  ;;  %741 = vmatprep.subr.bf16.mxu1 %v964_v0  ;;  %v627_v24 = vld [vmem:[#allocation7] ss:$0 sm:$0xff]  ;;  %v847_v32 = vld [vmem:[#allocation5 + $0xb0] sm:$0xff]   ;;  %v848_v33 = vld [vmem:[#allocation5 + $0xb8] sm:$0xff]   ;;  %p939_p0 = pnand %p938_p13, %p932_p10 }
  0x3f   :  { %v849_v34 = vld [vmem:[#allocation5 + $0xc0] sm:$0xff]   ;;  %v850_v35 = vld [vmem:[#allocation5 + $0xc8] sm:$0xff]   ;;  %v851_v36 = vld [vmem:[#allocation5 + $0xd0] sm:$0xff]  }
  0x40   :  { %v852_v37 = vld [vmem:[#allocation5 + $0xd8] sm:$0xff]   ;;  %v853_v38 = vld [vmem:[#allocation5 + $0xe0] sm:$0xff]   ;;  %v854_v39 = vld [vmem:[#allocation5 + $0xe8] sm:$0xff]  }
  0x41   :  { %722 = vmatpush3.bf16.msra.mxu0 %v827_v3  ;;  %742 = vmatpush3.bf16.msra.mxu1 %v835_v8  ;;  %v855_v40 = vld [vmem:[#allocation5 + $0xf0] sm:$0xff]   ;;  %v636_v41 = vld [vmem:[#allocation7 + $0x1] ss:$0 sm:$0xff]  ;;  %v856_v49 = vld [vmem:[#allocation5 + $0xf8] sm:$0xff]  }
  0x42   :  { %723 = vmatprep.subr.bf16.mxu0 %v964_v0  ;;  %743 = vmatprep.subr.bf16.mxu1 %v964_v0  ;;  %v857_v50 = vld [vmem:[#allocation5 + $0x100] sm:$0xff]   ;;  %v858_v51 = vld [vmem:[#allocation5 + $0x108] sm:$0xff]   ;;  %v859_v52 = vld [vmem:[#allocation5 + $0x110] sm:$0xff]  }
  0x43   :  { %v860_v53 = vld [vmem:[#allocation5 + $0x118] sm:$0xff]   ;;  %v861_v54 = vld [vmem:[#allocation5 + $0x120] sm:$0xff]   ;;  %v862_v55 = vld [vmem:[#allocation5 + $0x128] sm:$0xff]  }
  0x44   :  { %v645_v56 = vld [vmem:[#allocation7 + $0x2] ss:$0 sm:$0xff]  ;;  %v863_v63 = vld [vmem:[#allocation5 + $0x130] sm:$0xff]   ;;  %v864_v1 = vld [vmem:[#allocation5 + $0x138] sm:$0xff]  }
  0x45   :  { %724 = vmatpush3.bf16.msra.mxu0 %v828_v5  ;;  %744 = vmatpush3.bf16.msra.mxu1 %v836_v10  ;;  %v654_v2 = vld [vmem:[#allocation7 + $0x3] ss:$0 sm:$0xff]  ;;  %v663_v10 = vld [vmem:[#allocation7 + $0x4] ss:$0 sm:$0xff] }
  0x46   :  { %725 = vmatprep.subr.bf16.mxu0 %v964_v0  ;;  %745 = vmatprep.subr.bf16.mxu1 %v964_v0 }
  0x49   :  { %726 = vmatpush3.bf16.msra.mxu0 %v829_v7  ;;  %746 = vmatpush3.bf16.msra.mxu1 %v837_v12 }
  0x4a   :  { %727 = vmatprep.subr.bf16.mxu0 %v964_v0  ;;  %747 = vmatprep.subr.bf16.mxu1 %v964_v0 }
  0x4d   :  { %728 = vmatpush3.bf16.msra.mxu0 %v830_v9  ;;  %748 = vmatpush3.bf16.msra.mxu1 %v838_v14 }
  0x4e   :  { %729 = vmatprep.subr.bf16.mxu0 %v964_v0  ;;  %749 = vmatprep.subr.bf16.mxu1 %v964_v0 }
  0x51   :  { %730 = vmatpush3.bf16.msra.mxu0 %v831_v11  ;;  %750 = vmatpush3.bf16.msra.mxu1 %v839_v16 }
  0x52   :  { %731 = vmatprep.subr.bf16.mxu0 %v964_v0  ;;  %751 = vmatprep.subr.bf16.mxu1 %v964_v0 }
  0x55   :  { %732 = vmatpush3.bf16.msra.mxu0 %v832_v13  ;;  %752 = vmatpush3.bf16.msra.mxu1 %v840_v17 }
  0x56   :  { %757 = vmatprep.subr.bf16.mxu0 %v964_v0  ;;  %777 = vmatprep.subr.bf16.mxu1 %v964_v0 }
  0x58   :  { %734 = vmatmul.mubr.bf16.vlgmr.msra.gmra.mrb[0].mxu0 %v53_v15 }
  0x59   :  { %773 = vmatprep.mubr.msk.bf16.mxu0 %vm965_vm0, %v964_v0  ;;  %758 = vmatpush3.bf16.msra.mxu0 %v841_v18 }
  0x5a   :  { %759 = vmatprep.subr.bf16.mxu0 %v964_v0 }
  0x5d   :  { %760 = vmatpush3.bf16.msra.mxu0 %v842_v19 }
  0x5e   :  { %761 = vmatprep.subr.bf16.mxu0 %v964_v0 }
  0x61   :  { %762 = vmatpush3.bf16.msra.mxu0 %v843_v20 }
  0x62   :  { %763 = vmatprep.subr.bf16.mxu0 %v964_v0 }
  0x65   :  { %764 = vmatpush3.bf16.msra.mxu0 %v844_v21 }
  0x66   :  { %765 = vmatprep.subr.bf16.mxu0 %v964_v0 }
  0x69   :  { %766 = vmatpush3.bf16.msra.mxu0 %v845_v22 }
  0x6a   :  { %767 = vmatprep.subr.bf16.mxu0 %v964_v0 }
  0x6d   :  { %768 = vmatpush3.bf16.msra.mxu0 %v846_v23 }
  0x6e   :  { %769 = vmatprep.subr.bf16.mxu0 %v964_v0 }
  0x71   :  { %770 = vmatpush3.bf16.msra.mxu0 %v847_v32 }
  0x72   :  { %771 = vmatprep.subr.bf16.mxu0 %v964_v0 }
  0x75   :  { %772 = vmatpush3.bf16.msra.mxu0 %v848_v33 }
  0x76   :  { %797 = vmatprep.subr.bf16.mxu0 %v964_v0 }
 0x12b   :  { %v157_v25 = vpop.f32.mrb[0].mxu0 }
 0x12c   :  { %v158_v26 = vadd.f32 %v627_v24, %v157_v25  ;;  %v735_v27 = vpop.f32.mrb[1].mxu0 }
 0x12d   :  { %v160_v28 = vpop.f32.mrb[2].mxu0 }
 0x12e   :  { %v163_v29 = vmax.f32 %v158_v26, 0.0  ;;  %v736_v30 = vpop.f32.mrb[3].mxu0 }
 0x130   :  { %v164_v31 = vpack.c.bf16 %v163_v29, %v163_v29 }
 0x132   :  { %754 = vmatmul.mubr.bf16.vlgmr.msra.gmra.mrb[0].mxu1 %v164_v31 }
 0x133   :  { %793 = vmatprep.mubr.msk.bf16.mxu1 %vm965_vm0, %v964_v0  ;;  %778 = vmatpush3.bf16.msra.mxu1 %v849_v34 }
 0x134   :  { %779 = vmatprep.subr.bf16.mxu1 %v964_v0 }
 0x137   :  { %780 = vmatpush3.bf16.msra.mxu1 %v850_v35 }
 0x138   :  { %781 = vmatprep.subr.bf16.mxu1 %v964_v0 }
 0x13b   :  { %782 = vmatpush3.bf16.msra.mxu1 %v851_v36 }
 0x13c   :  { %783 = vmatprep.subr.bf16.mxu1 %v964_v0 }
 0x13f   :  { %784 = vmatpush3.bf16.msra.mxu1 %v852_v37 }
 0x140   :  { %785 = vmatprep.subr.bf16.mxu1 %v964_v0 }
 0x143   :  { %786 = vmatpush3.bf16.msra.mxu1 %v853_v38 }
 0x144   :  { %787 = vmatprep.subr.bf16.mxu1 %v964_v0 }
 0x147   :  { %788 = vmatpush3.bf16.msra.mxu1 %v854_v39 }
 0x148   :  { %789 = vmatprep.subr.bf16.mxu1 %v964_v0 }
 0x14b   :  { %790 = vmatpush3.bf16.msra.mxu1 %v855_v40 }
 0x14c   :  { %791 = vmatprep.subr.bf16.mxu1 %v964_v0 }
 0x14f   :  { %792 = vmatpush3.bf16.msra.mxu1 %v856_v49 }
 0x205   :  { %v269_v42 = vpop.f32.mrb[0].mxu1 }
 0x206   :  { %v270_v43 = vadd.f32 %v636_v41, %v269_v42  ;;  %v755_v44 = vpop.f32.mrb[1].mxu1 }
 0x207   :  { %v272_v45 = vpop.f32.mrb[2].mxu1 }
 0x208   :  { %v275_v46 = vmax.f32 %v270_v43, 0.0  ;;  %v756_v47 = vpop.f32.mrb[3].mxu1 }
 0x20a   :  { %v276_v48 = vpack.c.bf16 %v275_v46, %v275_v46 }
 0x20c   :  { %774 = vmatmul.mubr.bf16.vlgmr.msra.gmra.mrb[4].mxu0 %v276_v48 }
 0x20d   :  { %813 = vmatprep.mubr.msk.bf16.mxu0 %vm965_vm0, %v964_v0  ;;  %798 = vmatpush3.bf16.msra.mxu0 %v857_v50 }
 0x20e   :  { %799 = vmatprep.subr.bf16.mxu0 %v964_v0 }
 0x211   :  { %800 = vmatpush3.bf16.msra.mxu0 %v858_v51 }
 0x212   :  { %801 = vmatprep.subr.bf16.mxu0 %v964_v0 }
 0x215   :  { %802 = vmatpush3.bf16.msra.mxu0 %v859_v52 }
 0x216   :  { %803 = vmatprep.subr.bf16.mxu0 %v964_v0 }
 0x219   :  { %804 = vmatpush3.bf16.msra.mxu0 %v860_v53 }
 0x21a   :  { %805 = vmatprep.subr.bf16.mxu0 %v964_v0 }
 0x21d   :  { %806 = vmatpush3.bf16.msra.mxu0 %v861_v54 }
 0x21e   :  { %807 = vmatprep.subr.bf16.mxu0 %v964_v0 }
 0x221   :  { %808 = vmatpush3.bf16.msra.mxu0 %v862_v55 }
 0x222   :  { %809 = vmatprep.subr.bf16.mxu0 %v964_v0 }
 0x225   :  { %810 = vmatpush3.bf16.msra.mxu0 %v863_v63 }
 0x226   :  { %811 = vmatprep.subr.bf16.mxu0 %v964_v0 }
 0x229   :  { %812 = vmatpush3.bf16.msra.mxu0 %v864_v1 }
 0x2df   :  { %v381_v57 = vpop.f32.mrb[4].mxu0 }
 0x2e0   :  { %v382_v58 = vadd.f32 %v645_v56, %v381_v57  ;;  %v775_v59 = vpop.f32.mrb[5].mxu0 }
 0x2e1   :  { %v384_v60 = vpop.f32.mrb[6].mxu0 }
 0x2e2   :  { %v387_v61 = vpack.c.bf16 %v382_v58, %v382_v58  ;;  %v776_v62 = vpop.f32.mrb[7].mxu0 }
 0x2e4   :  { %794 = vmatmul.mubr.bf16.vlgmr.msra.gmra.mrb[4].mxu1 %v387_v61 }
 0x3b7   :  { %v492_v3 = vpop.f32.mrb[4].mxu1 }
 0x3b8   :  { %v493_v4 = vadd.f32 %v654_v2, %v492_v3  ;;  %v795_v5 = vpop.f32.mrb[5].mxu1 }
 0x3b9   :  { %v495_v6 = vpop.f32.mrb[6].mxu1 }
 0x3ba   :  { %v498_v7 = vmax.f32 %v493_v4, 0.0  ;;  %v796_v8 = vpop.f32.mrb[7].mxu1 }
 0x3bc   :  { %v499_v9 = vpack.c.bf16 %v498_v7, %v498_v7 }
 0x3be   :  { %814 = vmatmul.mubr.bf16.vlgmr.msra.gmra.mrb[8].mxu0 %v499_v9 }
 0x491   :  { %v604_v11 = vpop.f32.mrb[8].mxu0 }
 0x492   :  { %v605_v12 = vadd.f32 %v663_v10, %v604_v11  ;;  %v815_v13 = vpop.f32.mrb[9].mxu0 }
 0x493   :  { %v607_v14 = vpop.f32.mrb[10].mxu0 }
 0x494   :  { %610 = vst [vmem:[#allocation8] sm:$0xff] %v605_v12  ;;  %v816_v0 = vpop.f32.mrb[11].mxu0 }
 0x495   :  { %942 = shalt.err (!%p939_p0)
}
 0x496   :  { %s943_s25 = scalar_lea.hbm %s1088_s3, 128 }
 0x497   :  { %p944_p1 = scmp.ne.s32.totalorder %s1088_s3, %s943_s25  ;;  %p947_p2 = scmp.lt.u32.totalorder %s943_s25, %s1088_s3 }
 0x499   :  { %p949_p3 = pnand %p947_p2, %p944_p1 }
 0x49b   :  { %952 = shalt.err (!%p949_p3)
}
 0x49c   :  { %620 = dma.vmem_to_hbm [thread:$0]  %s618_s21, 128, %s1088_s3, [#allocation4]  }
 0x49d   :  { %957 = dma.done.wait [#allocation4], 128  }
 0x49e   :  { %958 = vsyncadd [#allocation4], 4294967168 }
 0x49f   :  { %624 = vsyncpa [#allocation3], 1 }
 0x4a0   :  { %625 = vsyncpa [#allocation6], 1 }
 0x4a1   :  { %626 = vsyncpa [#allocation4], 1 }

</bundles_post_ra>
